<compile_context>
chip_gen: v7x
topology: tpu7x:2x2x1
jax: 0.10.0
libtpu: 0.0.40
codegen_flags: <defaults>
</compile_context>

<pallas_src>
import jax
import jax.numpy as jnp
from jax.experimental import pallas as pl
from jax.experimental.pallas import tpu as pltpu


# --------------------------------------------------------------------------- kernel
def _ffn_kernel(x_ref, w1_ref, b1_ref, w2_ref, b2_ref, o_ref, acc_ref):
    # x_ref:  (tile_rows, d_model)            o_ref:  (tile_rows, d_model)
    # w1_ref: (d_model, tk_ff)   b1_ref: (1, tk_ff)
    # w2_ref: (tk_ff, d_model)   b2_ref: (1, d_model)
    # acc_ref: VMEM scratch (tile_rows, d_model) f32, resident across the k axis.
    k = pl.program_id(1)

    @pl.when(k == 0)
    def _():
        acc_ref[...] = jnp.zeros_like(acc_ref)

    x = x_ref[...]
    w1 = w1_ref[...]
    if x.dtype != w1.dtype:          # trace-time branch: cast down once for the MXU
        x = x.astype(w1.dtype)

    # Hidden slab for this d_ff chunk (f32 accumulate on the MXU, f32 bias+ReLU).
    h = jnp.dot(x, w1, preferred_element_type=jnp.float32)
    h = jnp.maximum(h + b1_ref[...].astype(jnp.float32), 0.0)
    # TODO(synk): nn.Dropout is identity in the forward/inference pass; training-mode
    # dropout (prng mask + 1/(1-p) scaling) is not implemented.

    acc_ref[...] += jnp.dot(h.astype(w2_ref.dtype), w2_ref[...],
                            preferred_element_type=jnp.float32)

    @pl.when(k == pl.num_programs(1) - 1)
    def _():
        y = acc_ref[...] + b2_ref[...].astype(jnp.float32)
        o_ref[...] = y.astype(o_ref.dtype)


# --------------------------------------------------------------------------- helpers
def _sublane_multiple(dtype):
    size = jnp.dtype(dtype).itemsize
    if size >= 4:
        return 8
    if size == 2:
        return 16
    return 32


def _pick_tile_rows(rows, dtype, target=256):
    if rows <= target:
        return rows                                   # full dim: always legal
    sub = _sublane_multiple(dtype)
    return max(sub, (target // sub) * sub)


def _pick_tk_ff(d_ff, target=512):
    if d_ff <= target:
        return d_ff                                   # single k step, full dim
    start = (min(target, d_ff) // 128) * 128
    for t in range(start, 0, -128):                   # largest 128-multiple dividing d_ff
        if d_ff % t == 0:
            return t
    return d_ff                                       # no clean divisor: keep resident


def _vmem_limit_bytes():
    try:
        cap = pltpu.get_tpu_info().vmem_capacity_bytes
    except Exception:
        cap = 64 * 1024 * 1024
    return int(cap * 3 // 4)                          # headroom for double buffers


def prepare_ffn_params(w1, b1, w2, b2, compute_dtype=None):
    """One-time parameter prep (hoisted out of the per-call path).

    w1: (d_ff, d_model), b1: (d_ff,)     -- torch nn.Linear layout
    w2: (d_model, d_ff), b2: (d_model,)
    Returns (w1_t, b1_2d, w2_t, b2_2d) laid out so the kernel computes x @ W.
    """
    w1_t = jnp.transpose(w1)            # (d_model, d_ff)
    w2_t = jnp.transpose(w2)            # (d_ff, d_model)
    b1_2d = b1.reshape(1, -1)
    b2_2d = b2.reshape(1, -1)
    if compute_dtype is not None:
        w1_t = w1_t.astype(compute_dtype)
        w2_t = w2_t.astype(compute_dtype)
        b1_2d = b1_2d.astype(compute_dtype)
        b2_2d = b2_2d.astype(compute_dtype)
    return w1_t, b1_2d, w2_t, b2_2d


# --------------------------------------------------------------------------- wrapper
def positionwise_feed_forward(x, params, *, tile_rows=None, tk_ff=None):
    """Fused FFN forward. x: (..., d_model); params from prepare_ffn_params()."""
    w1_t, b1_2d, w2_t, b2_2d = params
    d_model, d_ff = w1_t.shape

    orig_shape = x.shape
    x2d = x.reshape(-1, d_model)
    rows = x2d.shape[0]

    if tile_rows is None:
        tile_rows = _pick_tile_rows(rows, x2d.dtype)
    tile_rows = min(tile_rows, rows)
    if tk_ff is None:
        tk_ff = _pick_tk_ff(d_ff)
    assert d_ff % tk_ff == 0, "d_ff slab must divide d_ff"

    grid = (pl.cdiv(rows, tile_rows), d_ff // tk_ff)

    out2d = pl.pallas_call(
        _ffn_kernel,
        out_shape=jax.ShapeDtypeStruct((rows, d_model), x.dtype),
        grid_spec=pltpu.PrefetchScalarGridSpec(
            num_scalar_prefetch=0,
            grid=grid,
            in_specs=[
                pl.BlockSpec((tile_rows, d_model), lambda i, k: (i, 0)),   # x row tile
                pl.BlockSpec((d_model, tk_ff), lambda i, k: (0, k)),       # W1 slab
                pl.BlockSpec((1, tk_ff), lambda i, k: (0, k)),             # b1 slab
                pl.BlockSpec((tk_ff, d_model), lambda i, k: (k, 0)),       # W2 slab
                pl.BlockSpec((1, d_model), lambda i, k: (0, 0)),           # b2 (resident)
            ],
            out_specs=pl.BlockSpec((tile_rows, d_model), lambda i, k: (i, 0)),
            scratch_shapes=[pltpu.VMEM((tile_rows, d_model), jnp.float32)],
        ),
        compiler_params=pltpu.CompilerParams(
            dimension_semantics=("parallel", "arbitrary"),
            vmem_limit_bytes=_vmem_limit_bytes(),
        ),
    )(x2d, w1_t, b1_2d, w2_t, b2_2d)

    return out2d.reshape(orig_shape)


# --------------------------------------------------------------------------- reference
def positionwise_feed_forward_ref(x, w1, b1, w2, b2):
    """Pure-JAX reference mirroring the PyTorch forward (dropout = identity)."""
    h = jnp.maximum(x @ w1.T + b1, 0.0)
    return h @ w2.T + b2


# --------------------------------------------------------------------------- test
if __name__ == "__main__":
    key = jax.random.PRNGKey(0)

    # ---- test 1: small f32, single tile (batch=2, seq=8, d_model=32, d_ff=64) ----
    batch, seq, d_model, d_ff = 2, 8, 32, 64
    k_x, k_w1, k_w2, key = jax.random.split(key, 4)
    x = jax.random.normal(k_x, (batch, seq, d_model), dtype=jnp.float32)
    # kaiming-normal (fan_in, relu) weights, zero biases -- matches weight_init().
    w1 = jax.random.normal(k_w1, (d_ff, d_model), jnp.float32) * jnp.sqrt(2.0 / d_model)
    b1 = jnp.zeros((d_ff,), jnp.float32)
    w2 = jax.random.normal(k_w2, (d_model, d_ff), jnp.float32) * jnp.sqrt(2.0 / d_ff)
    b2 = jnp.zeros((d_model,), jnp.float32)

    params_f32 = prepare_ffn_params(w1, b1, w2, b2)
    out = jax.block_until_ready(positionwise_feed_forward(x, params_f32))
    ref = positionwise_feed_forward_ref(x, w1, b1, w2, b2)
    assert out.shape == x.shape and out.dtype == x.dtype
    assert jnp.allclose(out, ref, atol=2e-2, rtol=2e-2)

    # ---- test 2: multi-tile path (partial last row tile, 2 d_ff slabs, bf16 MXU) ----
    batch2, seq2, d_model2, d_ff2 = 5, 8, 128, 256   # rows=40 -> 3 row tiles of 16
    k_x2, k_w12, k_w22, key = jax.random.split(key, 4)
    x2 = jax.random.normal(k_x2, (batch2, seq2, d_model2), jnp.float32)
    w1_2 = jax.random.normal(k_w12, (d_ff2, d_model2), jnp.float32) * jnp.sqrt(2.0 / d_model2)
    b1_2 = jnp.zeros((d_ff2,), jnp.float32)
    w2_2 = jax.random.normal(k_w22, (d_model2, d_ff2), jnp.float32) * jnp.sqrt(2.0 / d_ff2)
    b2_2 = jnp.zeros((d_model2,), jnp.float32)

    params_bf16 = prepare_ffn_params(w1_2, b1_2, w2_2, b2_2, compute_dtype=jnp.bfloat16)
    out2 = jax.block_until_ready(
        positionwise_feed_forward(x2, params_bf16, tile_rows=16, tk_ff=128))
    ref2 = positionwise_feed_forward_ref(x2, w1_2, b1_2, w2_2, b2_2)
    assert out2.shape == x2.shape
    assert jnp.allclose(out2, ref2, atol=1e-1, rtol=5e-2)   # bf16 MXU tolerance

    print("KERNEL_OK")
</pallas_src>

<mosaic_0001>
module attributes {stable_mosaic.version = 11 : i64} {
  func.func @_ffn_kernel(%arg0: i32, %arg1: i32, %arg2: memref<16x32xf32, #tpu.memory_space<vmem>>, %arg3: memref<32x64xf32, #tpu.memory_space<vmem>>, %arg4: memref<1x64xf32, #tpu.memory_space<vmem>>, %arg5: memref<64x32xf32, #tpu.memory_space<vmem>>, %arg6: memref<1x32xf32, #tpu.memory_space<vmem>>, %arg7: memref<16x32xf32, #tpu.memory_space<vmem>>, %arg8: memref<16x32xf32, #tpu.memory_space<vmem>>) attributes {dimension_semantics = [#tpu.dimension_semantics<parallel>, #tpu.dimension_semantics<arbitrary>], iteration_bounds = array<i64: 1, 1>, scalar_prefetch = 0 : i64, scratch_operands = 1 : i64, tpu.core_type = #tpu.core_type<tc>, window_params = [{transform_indices = @transform_0, window_bounds = array<i64: 16, 32>}, {transform_indices = @transform_1, window_bounds = array<i64: 32, 64>}, {transform_indices = @transform_2, window_bounds = array<i64: 1, 64>}, {transform_indices = @transform_3, window_bounds = array<i64: 64, 32>}, {pipeline_mode = #tpu.pipeline_mode<synchronous>, transform_indices = @transform_4, window_bounds = array<i64: 1, 32>}, {transform_indices = @transform_5, window_bounds = array<i64: 16, 32>}]} {
    %c0_i32 = arith.constant 0 : i32
    %0 = arith.cmpi eq, %arg1, %c0_i32 : i32
    %1 = arith.extui %0 : i1 to i32
    %c0_i32_0 = arith.constant 0 : i32
    %2 = arith.cmpi ne, %1, %c0_i32_0 : i32
    scf.if %2 {
      %cst_16 = arith.constant 0.000000e+00 : f32
      %19 = vector.broadcast %cst_16 : f32 to vector<16x32xf32>
      %c0_17 = arith.constant 0 : index
      %c0_18 = arith.constant 0 : index
      %20 = vector.load %arg8[%c0_17, %c0_18] : memref<16x32xf32, #tpu.memory_space<vmem>>, vector<16x32xf32>
      tpu.vector_store %arg8[%c0_17, %c0_18], %19 {strides = array<i32>} : memref<16x32xf32, #tpu.memory_space<vmem>>, vector<16x32xf32>,
    } else {
    }
    %c0 = arith.constant 0 : index
    %c0_1 = arith.constant 0 : index
    %3 = vector.load %arg2[%c0, %c0_1] : memref<16x32xf32, #tpu.memory_space<vmem>>, vector<16x32xf32>
    %c0_2 = arith.constant 0 : index
    %c0_3 = arith.constant 0 : index
    %4 = vector.load %arg3[%c0_2, %c0_3] : memref<32x64xf32, #tpu.memory_space<vmem>>, vector<32x64xf32>
    %cst = arith.constant dense<0.000000e+00> : vector<16x64xf32>
    %5 = tpu.matmul %3, %4, %cst {dimension_numbers = #tpu.dot_dimension_numbers<[1], [0], [0], [1], [0, 0, 1, 1], [], []>} : vector<16x32xf32>, vector<32x64xf32>, vector<16x64xf32> -> vector<16x64xf32>
    %c0_4 = arith.constant 0 : index
    %c0_5 = arith.constant 0 : index
    %6 = vector.load %arg4[%c0_4, %c0_5] : memref<1x64xf32, #tpu.memory_space<vmem>>, vector<1x64xf32>
    %7 = vector.broadcast %6 : vector<1x64xf32> to vector<16x64xf32>
    %8 = arith.addf %5, %7 : vector<16x64xf32>
    %cst_6 = arith.constant 0.000000e+00 : f32
    %9 = vector.broadcast %cst_6 : f32 to vector<16x64xf32>
    %10 = arith.maximumf %8, %9 : vector<16x64xf32>
    %c0_7 = arith.constant 0 : index
    %c0_8 = arith.constant 0 : index
    %11 = vector.load %arg8[%c0_7, %c0_8] : memref<16x32xf32, #tpu.memory_space<vmem>>, vector<16x32xf32>
    %c0_9 = arith.constant 0 : index
    %c0_10 = arith.constant 0 : index
    %12 = vector.load %arg5[%c0_9, %c0_10] : memref<64x32xf32, #tpu.memory_space<vmem>>, vector<64x32xf32>
    %cst_11 = arith.constant dense<0.000000e+00> : vector<16x32xf32>
    %13 = tpu.matmul %10, %12, %cst_11 {dimension_numbers = #tpu.dot_dimension_numbers<[1], [0], [0], [1], [0, 0, 1, 1], [], []>} : vector<16x64xf32>, vector<64x32xf32>, vector<16x32xf32> -> vector<16x32xf32>
    %14 = arith.addf %11, %13 : vector<16x32xf32>
    %c0_12 = arith.constant 0 : index
    %c0_13 = arith.constant 0 : index
    %15 = vector.load %arg8[%c0_12, %c0_13] : memref<16x32xf32, #tpu.memory_space<vmem>>, vector<16x32xf32>
    tpu.vector_store %arg8[%c0_12, %c0_13], %14 {strides = array<i32>} : memref<16x32xf32, #tpu.memory_space<vmem>>, vector<16x32xf32>,
    %c0_i32_14 = arith.constant 0 : i32
    %16 = arith.cmpi eq, %arg1, %c0_i32_14 : i32
    %17 = arith.extui %16 : i1 to i32
    %c0_i32_15 = arith.constant 0 : i32
    %18 = arith.cmpi ne, %17, %c0_i32_15 : i32
    scf.if %18 {
      %c0_16 = arith.constant 0 : index
      %c0_17 = arith.constant 0 : index
      %19 = vector.load %arg8[%c0_16, %c0_17] : memref<16x32xf32, #tpu.memory_space<vmem>>, vector<16x32xf32>
      %c0_18 = arith.constant 0 : index
      %c0_19 = arith.constant 0 : index
      %20 = vector.load %arg6[%c0_18, %c0_19] : memref<1x32xf32, #tpu.memory_space<vmem>>, vector<1x32xf32>
      %21 = vector.broadcast %20 : vector<1x32xf32> to vector<16x32xf32>
      %22 = arith.addf %19, %21 : vector<16x32xf32>
      %c0_20 = arith.constant 0 : index
      %c0_21 = arith.constant 0 : index
      %23 = vector.load %arg7[%c0_20, %c0_21] : memref<16x32xf32, #tpu.memory_space<vmem>>, vector<16x32xf32>
      tpu.vector_store %arg7[%c0_20, %c0_21], %22 {strides = array<i32>} : memref<16x32xf32, #tpu.memory_space<vmem>>, vector<16x32xf32>,
    } else {
    }
    return
  }
  func.func @transform_0(%arg0: i32, %arg1: i32) -> (i32, i32) {
    %c0_i32 = arith.constant 0 : i32
    %c0_i32_0 = arith.constant 0 : i32
    return %arg0, %c0_i32 : i32, i32
  }
  func.func @transform_1(%arg0: i32, %arg1: i32) -> (i32, i32) {
    %c0_i32 = arith.constant 0 : i32
    %c0_i32_0 = arith.constant 0 : i32
    return %c0_i32, %arg1 : i32, i32
  }
  func.func @transform_2(%arg0: i32, %arg1: i32) -> (i32, i32) {
    %c0_i32 = arith.constant 0 : i32
    %c0_i32_0 = arith.constant 0 : i32
    return %c0_i32, %arg1 : i32, i32
  }
  func.func @transform_3(%arg0: i32, %arg1: i32) -> (i32, i32) {
    %c0_i32 = arith.constant 0 : i32
    %c0_i32_0 = arith.constant 0 : i32
    return %arg1, %c0_i32 : i32, i32
  }
  func.func @transform_4(%arg0: i32, %arg1: i32) -> (i32, i32) {
    %c0_i32 = arith.constant 0 : i32
    %c0_i32_0 = arith.constant 0 : i32
    %c0_i32_1 = arith.constant 0 : i32
    return %c0_i32, %c0_i32_0 : i32, i32
  }
  func.func @transform_5(%arg0: i32, %arg1: i32) -> (i32, i32) {
    %c0_i32 = arith.constant 0 : i32
    %c0_i32_0 = arith.constant 0 : i32
    return %arg0, %c0_i32 : i32, i32
  }
}

</mosaic_0001>

<bundles_post_ra>
// kernel: tpu_custom_call.1
= control target key start
LH: loop header
LB: loop body
LE: loop exit
PB: predicated region body
PF: predicated region fallthrough
CT: control target
= control target key end

     0   :  { %vm25_vm0 = vcmask 261120   ;;  %s459_s0 = inlined_call_operand.vmem [shape: f32[16,32], index: 0, kind: input, shape index: {}]   ;;  %s460_s1 = inlined_call_operand.vmem [shape: f32[32,64], index: 1, kind: input, shape index: {}]   ;;  %s461_s2 = inlined_call_operand.vmem [shape: f32[1,64], index: 2, kind: input, shape index: {}]   ;;  %s462_s3 = inlined_call_operand.vmem [shape: f32[64,32], index: 3, kind: input, shape index: {}]   ;;  %s463_s4 = inlined_call_operand.vmem [shape: f32[1,32], index: 4, kind: input, shape index: {}]   ;;  %s464_s5 = inlined_call_operand.hbm [shape: f32[16,32], index: 5, kind: output, shape index: {}]  }
   0x1   :  { %v30_v0 = vld [vmem:[%s460_s1] sm:$0xff]  ;;  %v31_v1 = vld [vmem:[%s460_s1 + $0x8] sm:$0xff]  ;;  %v32_v2 = vld [vmem:[%s460_s1 + $0x10] sm:$0xff] }
   0x2   :  { %v305_v3 = vpack.c.bf16 %v31_v1, %v30_v0  ;;  %v33_v4 = vld [vmem:[%s460_s1 + $0x18] sm:$0xff]  ;;  %v28_v5 = vld [vmem:[%s459_s0] sm:$0xff]  ;;  %v128_v8 = vld [vmem:[%s462_s3 + $0x8] sm:$0xff] }
   0x3   :  { %v309_v6 = vpack.c.bf16 %v33_v4, %v32_v2  ;;  %283 = vmatprep.mubr.msk.f32.mxu0 %vm25_vm0, %v28_v5  ;;  %v127_v7 = vld [vmem:[%s462_s3] sm:$0xff]  ;;  %v129_v9 = vld [vmem:[%s462_s3 + $0x10] sm:$0xff]  ;;  %v130_v11 = vld [vmem:[%s462_s3 + $0x18] sm:$0xff] }
   0x4   :  { %306 = vmatprep.subr.bf16.mxu0 %v305_v3  ;;  %v313_v10 = vpack.c.bf16 %v128_v8, %v127_v7  ;;  %v317_v12 = vpack.c.bf16 %v130_v11, %v129_v9  ;;  %v131_v13 = vld [vmem:[%s462_s3 + $0x20] sm:$0xff]  ;;  %v132_v14 = vld [vmem:[%s462_s3 + $0x28] sm:$0xff] }
   0x5   :  { %308 = vmatpush3.bf16.msra.mxu0 %v305_v3 }
   0x6   :  { %10 = vsyncpa [#allocation4], 0  ;;  %310 = vmatprep.subr.bf16.mxu0 %v309_v6  ;;  %314 = vmatprep.subr.bf16.mxu1 %v313_v10  ;;  %v321_v15 = vpack.c.bf16 %v132_v14, %v131_v13  ;;  %v29_v16 = vld [vmem:[%s459_s0 + $0x8] sm:$0xff]  ;;  %v133_v17 = vld [vmem:[%s462_s3 + $0x30] sm:$0xff]  ;;  %v357_v20 = vmov 0.0   ;;  %vm135_vm1 = vcmask 523264  }
   0x7   :  { %316 = vmatpush3.bf16.msra.mxu1 %v313_v10  ;;  %v134_v18 = vld [vmem:[%s462_s3 + $0x38] sm:$0xff]  ;;  %27 = vst.msk [vmem:[#allocation2 + $0x8] sm:$0xff] %vm25_vm0, %v357_v20  ;;  %26 = vst.msk [vmem:[#allocation2] sm:$0xff] %vm25_vm0, %v357_v20  ;;  %v253_v21 = vld [vmem:[%s461_s2] ss:$0 sm:$0xff]  ;;  %s358_s21 = smov [#allocation3]  }
   0x8   :  { %318 = vmatprep.subr.bf16.mxu1 %v317_v12  ;;  %v325_v19 = vpack.c.bf16 %v134_v18, %v133_v17  ;;  %v258_v34 = vld [vmem:[%s463_s4] ss:$0 sm:$0xff]  ;;  %s242_s22 = sshll.u32 %s358_s21, 4  ;;  %s243_s22 = int_to_ptr.vmem [resolvable:$true] %s242_s22 }
   0x9   :  { %312 = vmatpush3.bf16.msra.mxu0 %v309_v6  ;;  %s333_s23 = scalar_lea.vmem %s243_s22, 256  ;;  %p338_p1 = scmp.lt.s32.totalorder %s243_s22, %s243_s22 }
   0xa   :  { %p334_p0 = scmp.ne.s32.totalorder %s243_s22, %s333_s23  ;;  %p339_p2 = scmp.lt.s32.totalorder %s333_s23, %s333_s23 }
   0xb   :  { %320 = vmatpush3.bf16.msra.mxu1 %v317_v12 }
   0xc   :  { %284 = vmatmul.mubr.msk.f32.vlgmr.msra.gmra.mrb[0].mxu0 %vm25_vm0, %v29_v16  ;;  %322 = vmatprep.subr.bf16.mxu1 %v321_v15  ;;  %p340_p3 = por %p339_p2, %p338_p1 }
   0xe   :  { %v126_v28 = vld [vmem:[#allocation2 + $0x8] sm:$0xff]  ;;  %v125_v29 = vld [vmem:[#allocation2] sm:$0xff]  ;;  %p341_p4 = pnand %p340_p3, %p334_p0 }
   0xf   :  { %324 = vmatpush3.bf16.msra.mxu1 %v321_v15 }
  0x10   :  { %326 = vmatprep.subr.bf16.mxu1 %v325_v19 }
  0x13   :  { %328 = vmatpush3.bf16.msra.mxu1 %v325_v19 }
  0xdf   :  { %v285_v22 = vpop.f32.mrb[0].mxu0 }
  0xe0   :  { %v120_v23 = vadd.f32 %v285_v22, %v253_v21  ;;  %v114_v24 = vpop.f32.mrb[1].mxu0 }
  0xe1   :  { %v115_v25 = vadd.f32 %v253_v21, %v114_v24 }
  0xe2   :  { %v124_v27 = vmax.f32 %v120_v23, 0.0 }
  0xe3   :  { %v123_v26 = vmax.f32 %v115_v25, 0.0 }
  0xe5   :  { %302 = vmatprep.mubr.msk.f32.mxu1 %vm135_vm1, %v123_v26 }
  0xe6   :  { %303 = vmatmul.mubr.msk.f32.vlgmr.msra.gmra.mrb[0].mxu1 %vm135_vm1, %v124_v27 }
 0x1b9   :  { %v304_v30 = vpop.f32.mrb[0].mxu1 }
 0x1ba   :  { %v218_v31 = vadd.f32 %v304_v30, %v126_v28  ;;  %v208_v32 = vpop.f32.mrb[1].mxu1 }
 0x1bb   :  { %v217_v33 = vadd.f32 %v208_v32, %v125_v29 }
 0x1bc   :  { %220 = vst.msk [vmem:[#allocation2 + $0x8] sm:$0xff] %vm25_vm0, %v218_v31 }
 0x1bd   :  { %219 = vst.msk [vmem:[#allocation2] sm:$0xff] %vm25_vm0, %v217_v33 }
 0x1c3   :  { %v225_v35 = vld [vmem:[#allocation2 + $0x8] sm:$0xff] }
 0x1c4   :  { %v224_v36 = vld [vmem:[#allocation2] sm:$0xff]  ;;  %v234_v37 = vadd.f32 %v258_v34, %v225_v35 }
 0x1c5   :  { %v233_v38 = vadd.f32 %v258_v34, %v224_v36 }
 0x1c6   :  { %236 = vst.msk [vmem:[#allocation3 + $0x8] sm:$0xff] %vm25_vm0, %v234_v37 }
 0x1c7   :  { %235 = vst.msk [vmem:[#allocation3] sm:$0xff] %vm25_vm0, %v233_v38 }
 0x1c8   :  { %344 = shalt.err (!%p341_p4)
}
 0x1c9   :  { %s345_s25 = scalar_lea.hbm %s464_s5, 256 }
 0x1ca   :  { %p346_p5 = scmp.ne.s32.totalorder %s464_s5, %s345_s25  ;;  %p349_p6 = scmp.lt.u32.totalorder %s345_s25, %s464_s5 }
 0x1cc   :  { %p351_p7 = pnand %p349_p6, %p346_p5 }
 0x1ce   :  { %354 = shalt.err (!%p351_p7)
}
 0x1cf   :  { %s359_s30 = smov 128   ;;  %s360_s6 = smov 8  }
 0x1d0   :  { %248 = dma.vmem_to_hbm [thread:$0]  %s243_s22, 256, %s464_s5, [#allocation4], %s359_s30, %s359_s30, %s360_s6  }
 0x1d1   :  { %355 = dma.done.wait [#allocation4], 256  }
 0x1d2   :  { %356 = vsyncadd [#allocation4], 4294967040 }
 0x1d3   :  { %252 = vsyncpa [#allocation4], 1 }

</bundles_post_ra>
